<compile_context>
chip_gen: v5e
topology: v5e:2x2
jax: 0.10.0
libtpu: 0.0.40
codegen_flags: <defaults>
</compile_context>

<pallas_src>
import functools

import jax
import jax.numpy as jnp
from jax import lax
from jax.experimental import pallas as pl
from jax.experimental.pallas import tpu as pltpu


# ---------------------------------------------------------------------------
# Kernel: streaming global-average-pool over each (group, c-tile) slab.
# ---------------------------------------------------------------------------
def _pool_kernel(x_ref, o_ref, acc_ref, *, n_chunks, inv_s, unroll):
    # x_ref : (b, C_TILE, S_TILE)   current S tile of one (group, c-tile) slab
    # o_ref : (b, C_TILE)           pooled mean (group / c-tile dims squeezed)
    # acc_ref: (b, C_TILE, 128) f32 deferred-lane-reduce accumulator
    s = pl.program_id(2)

    @pl.when(s == 0)
    def _():
        acc_ref[...] = jnp.zeros_like(acc_ref)

    def body(j, acc):
        off = pl.multiple_of(j * 128, 128)
        # Upcast per 128-lane chunk: bf16 inputs accumulate in f32 (no-op for f32).
        return acc + x_ref[:, :, pl.ds(off, 128)].astype(jnp.float32)

    # Moderately unrolled fori_loop keeps the LLO scheduler fed without the
    # vreg-pressure blowup of a fully unrolled Python loop at large n_chunks.
    acc_ref[...] = lax.fori_loop(0, n_chunks, body, acc_ref[...], unroll=unroll)

    @pl.when(s == pl.num_programs(2) - 1)
    def _():
        # Single deferred cross-lane reduce + scale by 1/S.
        o_ref[...] = jnp.sum(acc_ref[...], axis=-1) * inv_s


# ---------------------------------------------------------------------------
# Tile sizing.
# ---------------------------------------------------------------------------
def _vmem_capacity_bytes():
    try:
        cap = getattr(pltpu.get_tpu_info(), "vmem_capacity_bytes", None)
        if cap:
            return int(cap)
    except Exception:
        pass
    return 64 * 2**20          # conservative fallback (v7x per-TC size)


def _c_tile_candidates(c):
    """Full c plus every multiple-of-8 divisor of c (largest first)."""
    cands = {c}
    t = 8
    while t < c:
        if c % t == 0:
            cands.add(t)
        t += 8
    return sorted(cands, reverse=True)


def _largest_s_tile(S, cap):
    """Largest multiple-of-128 divisor of S that is <= cap."""
    best, t = 128, 128
    while t <= cap:
        if S % t == 0:
            best = t
        t += 128
    return best


def _pick_tiles(b, c, S, *, x_bpe, budget, dual_tc, groups):
    cands = _c_tile_candidates(c)
    if dual_tc and groups % 2 == 1 and len(cands) > 1:
        # v7x has 2 TensorCores; when `groups` alone can't shard evenly, prefer
        # splitting c so the parallel work count (groups * n_c) is even.
        split = [t for t in cands if t <= c // 2]
        cands = split + [t for t in cands if t not in split]
    for c_tile in cands:
        acc_bytes = b * c_tile * 128 * 4
        avail = budget - acc_bytes - (1 << 20)
        lane_cap = ((avail // 2) // (b * c_tile * x_bpe)) // 128 * 128
        if lane_cap >= 128:
            return c_tile, _largest_s_tile(S, min(lane_cap, S))
    # TODO(synk): also tile along b when b*c is so large that even a
    # (b, 8, 128) double-buffered block exceeds the VMEM budget.
    raise ValueError("b*c too large for the VMEM budget; b-tiling not implemented")


# ---------------------------------------------------------------------------
# Wrapper.
# ---------------------------------------------------------------------------
@functools.partial(jax.jit, static_argnames=("groups",))
def sgse_pallas(x, w1, b1, w2, b2, *, groups):
    """x: (b, c, D, H, W) f32 or bf16.  Returns (groups, b, c) f32."""
    b, c, D, H, W = x.shape
    assert D % groups == 0, "D must be divisible by groups"
    S = (D // groups) * H * W          # per-group spatial volume
    total = D * H * W

    # TODO(synk): pad S up to a multiple of 128 (and correct the 1/S factor) for
    # shapes where (D//groups)*H*W % 128 != 0.
    assert S % 128 == 0, "per-group spatial volume must be a multiple of 128"

    x_bpe = jnp.dtype(x.dtype).itemsize
    cap = _vmem_capacity_bytes()
    dual_tc = cap <= 80 * 2**20        # heuristic: 64 MiB VMEM per TC => v7x (2 TCs)
    budget = int(cap * 0.75)           # ~96 MiB on v5e/v6e, ~48 MiB on v7x

    c_tile, s_tile = _pick_tiles(b, c, S, x_bpe=x_bpe, budget=budget,
                                 dual_tc=dual_tc, groups=groups)
    n_c = c // c_tile
    n_s = S // s_tile
    n_chunks = s_tile // 128
    unroll = max(1, min(8, n_chunks))

    # Free reshape (no HBM copy): group g occupies [g*S, (g+1)*S) of the last dim.
    x_flat = x.reshape(b, c, total)

    per_x_buf = b * c_tile * s_tile * x_bpe
    acc_bytes = b * c_tile * 128 * 4
    out_bytes = b * c_tile * 4
    footprint = 2 * per_x_buf + acc_bytes + 2 * out_bytes
    vmem_limit_bytes = int(min(cap, max(32 * 2**20, footprint + (4 << 20))))

    kernel = functools.partial(_pool_kernel, n_chunks=n_chunks, inv_s=1.0 / S,
                               unroll=unroll)

    cost = pl.CostEstimate(
        flops=b * c * total,
        transcendentals=0,
        bytes_accessed=b * c * total * x_bpe + groups * b * c * 4,
    )

    # TODO(synk): if an xprof trace on v7x still shows exposed DMA between
    # s-steps, sweep pipeline_mode=pl.Buffered(3) on the x BlockSpec (only if a
    # third buffer still fits the footprint above).
    pooled4 = pl.pallas_call(
        kernel,
        out_shape=jax.ShapeDtypeStruct((groups, n_c, b, c_tile), jnp.float32),
        grid_spec=pltpu.PrefetchScalarGridSpec(
            num_scalar_prefetch=0,
            grid=(groups, n_c, n_s),
            in_specs=[
                pl.BlockSpec((b, c_tile, s_tile),
                             lambda g, ci, s: (0, ci, g * n_s + s)),
            ],
            out_specs=pl.BlockSpec((None, None, b, c_tile),
                                   lambda g, ci, s: (g, ci, 0, 0)),
            scratch_shapes=[pltpu.VMEM((b, c_tile, 128), jnp.float32)],
        ),
        compiler_params=pltpu.CompilerParams(
            dimension_semantics=("parallel", "parallel", "arbitrary"),
            vmem_limit_bytes=vmem_limit_bytes,
        ),
        cost_estimate=cost,
    )(x_flat)                                          # (groups, n_c, b, c_tile)

    pooled = pooled4.transpose(0, 2, 1, 3).reshape(groups, b, c)

    # Tiny FC batched over all groups at once (plain XLA): one (groups*b, c)
    # matmul pair instead of per-group padded MXU ops inside the hot loop.
    h = jax.nn.relu(jnp.einsum('gbc,ch->gbh', pooled, w1,
                               preferred_element_type=jnp.float32) + b1)
    y = jax.nn.sigmoid(jnp.einsum('gbh,hc->gbc', h, w2,
                                  preferred_element_type=jnp.float32) + b2)
    return y


def sgse_layer_forward(x, params, *, groups):
    """Mirrors SGSELayer.forward: returns [[ (b, c, 1) per group ]]."""
    w1, b1, w2, b2 = params
    y = sgse_pallas(x, w1, b1, w2, b2, groups=groups)   # (groups, b, c)
    y3 = y[..., None]                                   # single expand, one split
    return [list(y3)]


def _reference(x, params, groups):
    """Pure-JAX reference for the same math."""
    w1, b1, w2, b2 = params
    b, c, D, H, W = x.shape
    dg = D // groups
    outs = []
    for g in range(groups):
        xs = x[:, :, g * dg:(g + 1) * dg]                  # (b, c, dg, H, W)
        pooled = jnp.mean(xs, axis=(2, 3, 4))              # (b, c)
        h = jnp.maximum(pooled @ w1 + b1, 0.0)
        outs.append(jax.nn.sigmoid(h @ w2 + b2))
    return jnp.stack(outs, axis=0)                         # (groups, b, c)


if __name__ == "__main__":
    # Small, module-consistent shapes.
    batch, channel, D, H, W = 2, 32, 8, 8, 8
    reduction = 4            # SGSELayer(channel=32, reduction=4) -> hidden = 8
    groups = 2               # split along input_shape[cfg['d']] == D (cfg['d'] = 0)
    hidden = channel // reduction

    key = jax.random.PRNGKey(0)
    kx, k1, k2, k3, k4 = jax.random.split(key, 5)

    x = jax.random.normal(kx, (batch, channel, D, H, W), dtype=jnp.float32)

    # Deterministic synthetic parameters for fc[0]:
    #   Linear(channel, hidden): torch weight (hidden, channel); stored transposed (channel, hidden).
    #   Linear(hidden, channel): torch weight (channel, hidden); stored transposed (hidden, channel).
    w1 = (jax.random.normal(k1, (channel, hidden), dtype=jnp.float32)
          / jnp.sqrt(channel))
    b1 = jax.random.normal(k2, (hidden,), dtype=jnp.float32) * 0.1
    w2 = (jax.random.normal(k3, (hidden, channel), dtype=jnp.float32)
          / jnp.sqrt(hidden))
    b2 = jax.random.normal(k4, (channel,), dtype=jnp.float32) * 0.1
    params = (w1, b1, w2, b2)

    out_nested = sgse_layer_forward(x, params, groups=groups)
    for y_g in out_nested[0]:
        jax.block_until_ready(y_g)

    got = jnp.stack([y_g[..., 0] for y_g in out_nested[0]], axis=0)
    want = _reference(x, params, groups)
    assert got.shape == (groups, batch, channel)
    assert out_nested[0][0].shape == (batch, channel, 1)
    assert jnp.allclose(got, want, atol=1e-5, rtol=1e-5), "mismatch vs reference"

    print("KERNEL_OK")
</pallas_src>

<mosaic_0001>
module attributes {stable_mosaic.version = 11 : i64} {
  func.func @_pool_kernel(%arg0: i32, %arg1: i32, %arg2: i32, %arg3: memref<2x32x256xf32, #tpu.memory_space<vmem>>, %arg4: memref<1x1x2x32xf32, #tpu.memory_space<vmem>>, %arg5: memref<2x32x128xf32, #tpu.memory_space<vmem>>) attributes {dimension_semantics = [#tpu.dimension_semantics<parallel>, #tpu.dimension_semantics<parallel>, #tpu.dimension_semantics<arbitrary>], iteration_bounds = array<i64: 2, 1, 1>, scalar_prefetch = 0 : i64, scratch_operands = 1 : i64, tpu.core_type = #tpu.core_type<tc>, window_params = [{transform_indices = @transform_0, window_bounds = array<i64: 2, 32, 256>}, {transform_indices = @transform_1, window_bounds = array<i64: 1, 1, 2, 32>}]} {
    %c0_i32 = arith.constant 0 : i32
    %0 = arith.cmpi eq, %arg2, %c0_i32 : i32
    %1 = arith.extui %0 : i1 to i32
    %c0_i32_0 = arith.constant 0 : i32
    %2 = arith.cmpi ne, %1, %c0_i32_0 : i32
    scf.if %2 {
      %cst = arith.constant 0.000000e+00 : f32
      %18 = vector.broadcast %cst : f32 to vector<2x32x128xf32>
      %c0_14 = arith.constant 0 : index
      %c0_15 = arith.constant 0 : index
      %c0_16 = arith.constant 0 : index
      %19 = vector.load %arg5[%c0_14, %c0_15, %c0_16] : memref<2x32x128xf32, #tpu.memory_space<vmem>>, vector<2x32x128xf32>
      tpu.vector_store %arg5[%c0_14, %c0_15, %c0_16], %18 {strides = array<i32>} : memref<2x32x128xf32, #tpu.memory_space<vmem>>, vector<2x32x128xf32>,
    } else {
    }
    %c0 = arith.constant 0 : index
    %c0_1 = arith.constant 0 : index
    %c0_2 = arith.constant 0 : index
    %3 = vector.load %arg5[%c0, %c0_1, %c0_2] : memref<2x32x128xf32, #tpu.memory_space<vmem>>, vector<2x32x128xf32>
    %c0_i32_3 = arith.constant 0 : i32
    %c128_i32 = arith.constant 128 : i32
    %4 = arith.muli %c0_i32_3, %c128_i32 : i32
    %5 = tpu.assume_multiple %4, 128 : i32
    %c0_4 = arith.constant 0 : index
    %c0_5 = arith.constant 0 : index
    %6 = arith.index_cast %5 : i32 to index
    %7 = vector.load %arg3[%c0_4, %c0_5, %6] : memref<2x32x256xf32, #tpu.memory_space<vmem>>, vector<2x32x128xf32>
    %8 = arith.addf %3, %7 : vector<2x32x128xf32>
    %c1_i32 = arith.constant 1 : i32
    %c128_i32_6 = arith.constant 128 : i32
    %9 = arith.muli %c1_i32, %c128_i32_6 : i32
    %10 = tpu.assume_multiple %9, 128 : i32
    %c0_7 = arith.constant 0 : index
    %c0_8 = arith.constant 0 : index
    %11 = arith.index_cast %10 : i32 to index
    %12 = vector.load %arg3[%c0_7, %c0_8, %11] : memref<2x32x256xf32, #tpu.memory_space<vmem>>, vector<2x32x128xf32>
    %13 = arith.addf %8, %12 : vector<2x32x128xf32>
    %c2_i32 = arith.constant 2 : i32
    %c0_9 = arith.constant 0 : index
    %c0_10 = arith.constant 0 : index
    %c0_11 = arith.constant 0 : index
    %14 = vector.load %arg5[%c0_9, %c0_10, %c0_11] : memref<2x32x128xf32, #tpu.memory_space<vmem>>, vector<2x32x128xf32>
    tpu.vector_store %arg5[%c0_9, %c0_10, %c0_11], %13 {strides = array<i32>} : memref<2x32x128xf32, #tpu.memory_space<vmem>>, vector<2x32x128xf32>,
    %c0_i32_12 = arith.constant 0 : i32
    %15 = arith.cmpi eq, %arg2, %c0_i32_12 : i32
    %16 = arith.extui %15 : i1 to i32
    %c0_i32_13 = arith.constant 0 : i32
    %17 = arith.cmpi ne, %16, %c0_i32_13 : i32
    scf.if %17 {
      %c0_14 = arith.constant 0 : index
      %c0_15 = arith.constant 0 : index
      %c0_16 = arith.constant 0 : index
      %18 = vector.load %arg5[%c0_14, %c0_15, %c0_16] : memref<2x32x128xf32, #tpu.memory_space<vmem>>, vector<2x32x128xf32>
      %cst = arith.constant dense<0.000000e+00> : vector<2x32xf32>
      %19 = vector.multi_reduction <add>, %18, %cst [2] : vector<2x32x128xf32> to vector<2x32xf32>
      %cst_17 = arith.constant 3.906250e-03 : f32
      %20 = vector.broadcast %cst_17 : f32 to vector<2x32xf32>
      %21 = arith.mulf %19, %20 : vector<2x32xf32>
      %c0_18 = arith.constant 0 : index
      %c0_19 = arith.constant 0 : index
      %c0_20 = arith.constant 0 : index
      %c0_21 = arith.constant 0 : index
      %22 = vector.load %arg4[%c0_18, %c0_19, %c0_20, %c0_21] : memref<1x1x2x32xf32, #tpu.memory_space<vmem>>, vector<1x1x2x32xf32>
      %23 = vector.shape_cast %22 : vector<1x1x2x32xf32> to vector<2x32xf32>
      %24 = vector.shape_cast %21 : vector<2x32xf32> to vector<1x1x2x32xf32>
      tpu.vector_store %arg4[%c0_18, %c0_19, %c0_20, %c0_21], %24 {strides = array<i32>} : memref<1x1x2x32xf32, #tpu.memory_space<vmem>>, vector<1x1x2x32xf32>,
    } else {
    }
    return
  }
  func.func @transform_0(%arg0: i32, %arg1: i32, %arg2: i32) -> (i32, i32, i32) {
    %c1_i32 = arith.constant 1 : i32
    %0 = arith.muli %arg0, %c1_i32 : i32
    %1 = arith.addi %0, %arg2 : i32
    %c0_i32 = arith.constant 0 : i32
    %c0_i32_0 = arith.constant 0 : i32
    return %c0_i32, %arg1, %1 : i32, i32, i32
  }
  func.func @transform_1(%arg0: i32, %arg1: i32, %arg2: i32) -> (i32, i32, i32, i32) {
    %c0_i32 = arith.constant 0 : i32
    %c0_i32_0 = arith.constant 0 : i32
    %c0_i32_1 = arith.constant 0 : i32
    return %arg0, %arg1, %c0_i32, %c0_i32_0 : i32, i32, i32, i32
  }
}

</mosaic_0001>

<bundles_post_ra>
// kernel: sgse_pallas.1
= control target key start
LH: loop header
LB: loop body
LE: loop exit
PB: predicated region body
PF: predicated region fallthrough
CT: control target
= control target key end

     0   :  { %s529_s6 = smov 0   ;;  %s531_s7 = smov 0   ;;  %s613_s0 = inlined_call_operand.vmem [shape: f32[2,32,512], index: 0, kind: input, shape index: {}]   ;;  %s614_s1 = inlined_call_operand.vmem [shape: f32[2,1,2,32], index: 1, kind: output, shape index: {}]  }
   0x1   :  { %s533_s8 = smov 0   ;;  %s535_s9 = smov 0  }
   0x2   :  { %s537_s10 = smov 0  }
   0x3 LB: > { %s30_s11 = sadd.s32 1, %s513_s9  ;;  %p48_p1 = scmp.ne.s32.totalorder %s505_s7, %s501_s6  ;;  %s517_s10 = sphi %s537_s10, %s11_s10   ;;  %s513_s9 = sphi %s535_s9, %s618_s9   ;;  %s509_s8 = sphi %s533_s8, %s617_s8   ;;  %s505_s7 = sphi %s531_s7, %s616_s7   ;;  %s501_s6 = sphi %s529_s6, %s615_s6  }
   0x4   : > { %p32_p0 = scmp.ge.s32.totalorder %s30_s11, 2  ;;  %p49_p2 = scmp.eq.s32.totalorder %s517_s10, 0 }
   0x5   : > { %s41_s13 = sadd.s32 1, %s505_s7  ;;  %p421_p5 = scmp.ge.s32.totalorder %s517_s10, 2 }
   0x6   : > { %s620_s11 = smov (%p32_p0, %s30_s11), 0  ;;  %p50_p3 = por %p49_p2, %p48_p1 }
   0x7   : > { %s37_s12 = ssub.s32 %s513_s9, %s620_s11  ;;  %102 = sbr.rel (%p421_p5) target bundleno = 32 (0x20), region = 16 }
   0x8   : > { %p39_p4 = scmp.eq.s32.totalorder %s37_s12, 0 }
   0xa   : > { %s564_s14 = scalar_select %p39_p4, %s505_s7, %s41_s13  }
   0xc   : > { %105 = sbr.rel (!%p50_p3) target bundleno = 32 (0x20), region = 20  ;;  %s107_s15 = sand.u32 (%p50_p3), 1, %s505_s7  }
   0xd   : > { %s438_s16 = sshll.u32 (%p50_p3), %s513_s9, 4  ;;  %s422_s17 = sshll.u32 (%p50_p3), %s107_s15, 7 }
   0xe   : > { %s572_s20 = scalar_lea.vmem (%p50_p3), %s613_s0, %s438_s16  ;;  %s109_s21 = scalar_lea.vmem (%p50_p3), [#allocation3], %s422_s17 }
   0xf   : > { %v129_v0 = vld [vmem:[%s572_s20] sm:$0xff] (%p50_p3)  ;;  %v131_v1 = vld [vmem:[%s572_s20 + $0x8] sm:$0xff] (%p50_p3) }
  0x10   : > { %v133_v2 = vld [vmem:[%s572_s20 + $0x20] sm:$0xff] (%p50_p3)  ;;  %130 = vst [vmem:[%s109_s21] sm:$0xff] (%p50_p3), %v129_v0  ;;  %v135_v3 = vld [vmem:[%s572_s20 + $0x28] sm:$0xff] (%p50_p3) }
  0x11   : > { %132 = vst [vmem:[%s109_s21 + $0x8] sm:$0xff] %v131_v1  ;;  %v137_v4 = vld [vmem:[%s572_s20 + $0x40] sm:$0xff]  ;;  %v139_v5 = vld [vmem:[%s572_s20 + $0x48] sm:$0xff] }
  0x12   : > { %134 = vst [vmem:[%s109_s21 + $0x10] sm:$0xff] %v133_v2  ;;  %v141_v6 = vld [vmem:[%s572_s20 + $0x60] sm:$0xff]  ;;  %v143_v7 = vld [vmem:[%s572_s20 + $0x68] sm:$0xff] }
  0x13   : > { %136 = vst [vmem:[%s109_s21 + $0x18] sm:$0xff] %v135_v3  ;;  %v145_v8 = vld [vmem:[%s572_s20 + $0x80] sm:$0xff]  ;;  %v147_v9 = vld [vmem:[%s572_s20 + $0x88] sm:$0xff] }
  0x14   : > { %138 = vst [vmem:[%s109_s21 + $0x20] sm:$0xff] %v137_v4  ;;  %v149_v10 = vld [vmem:[%s572_s20 + $0xa0] sm:$0xff]  ;;  %v151_v11 = vld [vmem:[%s572_s20 + $0xa8] sm:$0xff] }
  0x15   : > { %140 = vst [vmem:[%s109_s21 + $0x28] sm:$0xff] %v139_v5  ;;  %v153_v12 = vld [vmem:[%s572_s20 + $0xc0] sm:$0xff]  ;;  %v155_v13 = vld [vmem:[%s572_s20 + $0xc8] sm:$0xff] }
  0x16   : > { %142 = vst [vmem:[%s109_s21 + $0x30] sm:$0xff] %v141_v6  ;;  %v157_v14 = vld [vmem:[%s572_s20 + $0xe0] sm:$0xff]  ;;  %v159_v15 = vld [vmem:[%s572_s20 + $0xe8] sm:$0xff] }
  0x17   : > { %144 = vst [vmem:[%s109_s21 + $0x38] sm:$0xff] %v143_v7 }
  0x18   : > { %146 = vst [vmem:[%s109_s21 + $0x40] sm:$0xff] %v145_v8 }
  0x19   : > { %148 = vst [vmem:[%s109_s21 + $0x48] sm:$0xff] %v147_v9 }
  0x1a   : > { %150 = vst [vmem:[%s109_s21 + $0x50] sm:$0xff] %v149_v10 }
  0x1b   : > { %152 = vst [vmem:[%s109_s21 + $0x58] sm:$0xff] %v151_v11 }
  0x1c   : > { %154 = vst [vmem:[%s109_s21 + $0x60] sm:$0xff] %v153_v12 }
  0x1d   : > { %156 = vst [vmem:[%s109_s21 + $0x68] sm:$0xff] %v155_v13 }
  0x1e   : > { %158 = vst [vmem:[%s109_s21 + $0x70] sm:$0xff] %v157_v14 }
  0x1f   : > { %160 = vst [vmem:[%s109_s21 + $0x78] sm:$0xff] %v159_v15 }
  0x20 PF: > { %p425_p6 = scmp.ge.s32.totalorder %s517_s10, 1  ;;  %p165_p7 = scmp.lt.s32.totalorder %s517_s10, 3 }
  0x22   : > { %p166_p8 = pnand %p425_p6, %p165_p7 }
  0x23   : > { %s172_s22 = sand.u32 (!%p166_p8), 1, %s501_s6   ;;  %p196_p9 = scmp.lt.s32.totalorder (!%p166_p8), %s509_s8, 1 }
  0x24   : > { %169 = sbr.rel (%p166_p8) target bundleno = 184 (0xb8), region = 43  ;;  %s426_s23 = sshll.u32 (!%p166_p8), %s172_s22, 7 }
  0x25   : > { %s174_s24 = scalar_lea.vmem (!%p166_p8), [#allocation3], %s426_s23 }
  0x29   : > { %v227_v16 = vld [vmem:[%s174_s24 + $0x40] sm:$0xff]  ;;  %v432_v17 = vld [vmem:[%s174_s24 + $0x48] sm:$0xff]  ;;  %v228_v25 = vld [vmem:[%s174_s24 + $0x50] sm:$0xff]  ;;  %v307_v43 = vlaneseq  ;;  %vm312_vm0 = vcmask 130112   ;;  %s622_s8 = smov (!%p196_p9, %s509_s8), 1  ;;  %vm316_vm1 = vcmask 195712  }
  0x2a   : > { %v223_v18 = vld [vmem:[%s174_s24] sm:$0xff]  ;;  %v252_v19 = vadd.f32 %v432_v17, %v227_v16  ;;  %v428_v20 = vld [vmem:[%s174_s24 + $0x8] sm:$0xff]  ;;  %v433_v26 = vld [vmem:[%s174_s24 + $0x58] sm:$0xff]  ;;  %vm320_vm2 = vcmask 261312   ;;  %s427_s25 = sshll.u32 %s622_s8, 1  ;;  %vm329_vm3 = vcmask 1041409  }
  0x2b   : > { %v225_v21 = vld [vmem:[%s174_s24 + $0x20] sm:$0xff]  ;;  %v430_v22 = vld [vmem:[%s174_s24 + $0x28] sm:$0xff]  ;;  %v248_v23 = vadd.f32 %v428_v20, %v223_v18  ;;  %v224_v27 = vld [vmem:[%s174_s24 + $0x10] sm:$0xff]  ;;  %v253_v31 = vadd.f32 %v433_v26, %v228_v25  ;;  %v308_v44 = vand.u32 127, %v307_v43  ;;  %s202_s28 = scalar_lea.vmem %s614_s1, %s427_s25  ;;  %vm332_vm4 = vcmask 254976  }
  0x2c   : > { %v250_v24 = vadd.f32 %v430_v22, %v225_v21  ;;  %283 = vadd.xlane.f32.xlu1 %v252_v19  ;;  %v429_v28 = vld [vmem:[%s174_s24 + $0x18] sm:$0xff]  ;;  %v229_v29 = vld [vmem:[%s174_s24 + $0x60] sm:$0xff]  ;;  %v434_v30 = vld [vmem:[%s174_s24 + $0x68] sm:$0xff] }
  0x2d   : > { %275 = vadd.xlane.f32.xlu0 %v248_v23  ;;  %v249_v32 = vadd.f32 %v429_v28, %v224_v27  ;;  %v254_v33 = vadd.f32 %v434_v30, %v229_v29  ;;  %v230_v34 = vld [vmem:[%s174_s24 + $0x70] sm:$0xff]  ;;  %v435_v35 = vld [vmem:[%s174_s24 + $0x78] sm:$0xff]  ;;  %v310_v46 = vadd.s32 4294967288, %v308_v44  ;;  %v314_v55 = vadd.s32 4294967280, %v308_v44 }
  0x2e   : > { %279 = vadd.xlane.f32.xlu2 %v250_v24  ;;  %v226_v36 = vld [vmem:[%s174_s24 + $0x30] sm:$0xff]  ;;  %v431_v37 = vld [vmem:[%s174_s24 + $0x38] sm:$0xff]  ;;  %v255_v38 = vadd.f32 %v435_v35, %v230_v34  ;;  %v318_v59 = vadd.s32 4294967272, %v308_v44 }
  0x2f   : > { %v251_v39 = vadd.f32 %v431_v37, %v226_v36 }
  0x34   : > { %285 = vadd.xlane.f32.xlu1 %v253_v31 }
  0x35   : > { %277 = vadd.xlane.f32.xlu0 %v249_v32 }
  0x36   : > { %287 = vadd.xlane.f32.xlu2 %v254_v33 }
  0x3c   : > { %289 = vadd.xlane.f32.xlu1 %v255_v38 }
  0x3d   : > { %281 = vadd.xlane.f32.xlu0 %v251_v39 }
  0x9f   : > { %v284_v40 = vpop.xlane.xlu1 %283 }
  0xa0   : > { %v276_v41 = vpop.xlane.xlu0 %275  ;;  %v295_v51 = vmul.f32 0.00390625, %v284_v40 }
  0xa1   : > { %v280_v42 = vpop.xlane.xlu2 %279  ;;  %v291_v52 = vmul.f32 0.00390625, %v276_v41 }
  0xa2   : > { %v322_v57 = vperm.slane %v295_v51, %v308_v44  ;;  %v293_v58 = vmul.f32 0.00390625, %v280_v42 }
  0xa3   : > { %v309_v60 = vperm.slane %v291_v52, %v308_v44 }
  0xa4   : > { %v315_v4 = vperm.slane %v293_v58, %v314_v55 }
  0xa7   : > { %v286_v45 = vpop.xlane.xlu1 %285 }
  0xa8   : > { %v296_v47 = vmul.f32 0.00390625, %v286_v45  ;;  %v278_v48 = vpop.xlane.xlu0 %277 }
  0xa9   : > { %v288_v49 = vpop.xlane.xlu2 %287  ;;  %v292_v50 = vmul.f32 0.00390625, %v278_v48 }
  0xaa   : > { %v297_v53 = vmul.f32 0.00390625, %v288_v49  ;;  %v323_v54 = vperm.slane %v296_v47, %v310_v46 }
  0xab   : > { %v311_v56 = vperm.slane %v292_v50, %v310_v46 }
  0xac   : > { %v325_v61 = vperm.slane %v297_v53, %v314_v55  ;;  %v324_v63 = vsel %vm312_vm0, %v323_v54, %v322_v57 }
  0xad   : > { %v313_v2 = vsel %vm312_vm0, %v311_v56, %v309_v60 }
  0xae   : > { %v326_v6 = vsel %vm316_vm1, %v325_v61, %v324_v63  ;;  %v317_v9 = vsel %vm316_vm1, %v315_v4, %v313_v2 }
  0xaf   : > { %v290_v62 = vpop.xlane.xlu1 %289 }
  0xb0   : > { %v298_v0 = vmul.f32 0.00390625, %v290_v62  ;;  %v282_v1 = vpop.xlane.xlu0 %281 }
  0xb1   : > { %v294_v3 = vmul.f32 0.00390625, %v282_v1 }
  0xb2   : > { %v327_v5 = vperm.slane %v298_v0, %v318_v59 }
  0xb3   : > { %v319_v7 = vperm.slane %v294_v3, %v318_v59 }
  0xb4   : > { %v328_v8 = vsel %vm320_vm2, %v327_v5, %v326_v6 }
  0xb5   : > { %v321_v10 = vsel %vm320_vm2, %v319_v7, %v317_v9 }
  0xb6   : > { %v330_v11 = vsel %vm329_vm3, %v328_v8, %v321_v10 }
  0xb7   : > { %333 = vst.msk [vmem:[%s202_s28] sm:$0x3] %vm332_vm4, %v330_v11 }
  0xb8 PF: > { %s11_s10 = sadd.s32 1, %s517_s10   ;;  %s615_s6 = smov %s505_s7 }
  0xb9   : > { %p8_p10 = scmp.ge.s32.totalorder %s11_s10, 4   ;;  %s616_s7 = smov %s564_s14 }
  0xba   : > { %s617_s8 = smov %s513_s9  ;;  %s618_s9 = smov %s620_s11 }
  0xbb   :  { %10 = sbr.rel (!%p8_p10) target bundleno = 3 (0x3), region = 91 }

</bundles_post_ra>
